<compile_context>
chip_gen: v7x
topology: tpu7x:2x2x1
jax: 0.10.0
libtpu: 0.0.40
codegen_flags: <defaults>
</compile_context>

<pallas_src>
import numpy as np
import jax
import jax.numpy as jnp
from jax.experimental import pallas as pl
from jax.experimental.pallas import tpu as pltpu


# ----------------------------------------------------------------------------
# Fused kernel: one grid step per VecPredict layer.
# Per layer (all dense block ops, no per-edge loops):
#   msg  = x[src] + rel_emb[edge_type]          (one-hot gather matmuls)
#   s    = msg @ W^T + b                        (attn_lin, bf16 operands on MXU)
#   p    = exp(s - colmax) masked to valid edges
#   den  = scatter_add(p, tgt)                  (one-hot segment-sum matmul)
#   num  = scatter_add(msg * p, tgt)            (one-hot segment-sum matmul)
#   x   += num * reciprocal(den)                (residual update; x stays in VMEM)
# ----------------------------------------------------------------------------
def _make_fused_kernel(n_nodes, e_max, n_rel):
    def kernel(ne_ref,                             # scalar prefetch (SMEM): per-layer edge counts
               src_ref, tgt_ref, et_ref,           # per-layer int32 indices (VMEM)
               x0_ref, rel_ref, w_ref, b_ref,      # node init, relation table, attn params
               x_ref):                             # output: resident (N, H) accumulator
        l = pl.program_id(0)

        @pl.when(l == 0)
        def _init():
            x_ref[...] = x0_ref[...]

        n_e = ne_ref[l]                            # scalar int32 from SMEM
        x = x_ref[...]                             # (N, H) f32, resident across layers

        src_col = src_ref[...]                     # (E_MAX, 1) int32
        et_col = et_ref[...]                       # (E_MAX, 1) int32
        tgt_row = tgt_ref[...]                     # (1, E_MAX) int32

        # validity mask for pad edges (one vectorized compare, no scalar branches)
        edge_iota_col = jax.lax.broadcasted_iota(jnp.int32, (e_max, 1), 0)
        valid_col = edge_iota_col < n_e            # (E_MAX, 1) bool

        # 1) gather x[src] and rel_table[edge_type] with in-VMEM one-hot matmuls (MXU).
        node_iota_en = jax.lax.broadcasted_iota(jnp.int32, (e_max, n_nodes), 1)
        src_1h = (node_iota_en == src_col).astype(jnp.float32)        # (E_MAX, N)
        rel_iota_er = jax.lax.broadcasted_iota(jnp.int32, (e_max, n_rel), 1)
        et_1h = (rel_iota_er == et_col).astype(jnp.float32)           # (E_MAX, R)
        msg = (jnp.dot(src_1h, x, preferred_element_type=jnp.float32)
               + jnp.dot(et_1h, rel_ref[...],
                         preferred_element_type=jnp.float32))         # (E_MAX, H) f32

        # 2) attention logits: bf16 operands, f32 accumulation.
        s = jnp.dot(msg.astype(jnp.bfloat16), w_ref[...],
                    preferred_element_type=jnp.float32) + b_ref[...]  # (E_MAX, H) f32

        # 3) softmax over edges sharing a target node.  The shift uses the global
        #    per-feature max over valid edges (per-group softmax is invariant to any
        #    constant-per-group shift), keeping this step fully vectorized.
        s_for_max = jnp.where(valid_col, s, -1e30)
        gmax = jnp.max(s_for_max, axis=0, keepdims=True)              # (1, H)
        p = jnp.where(valid_col, jnp.exp(s - gmax), 0.0)              # (E_MAX, H)

        # 4) segment sums as one-hot scatter matmuls on the (otherwise idle) MXU.
        node_iota_ne = jax.lax.broadcasted_iota(jnp.int32, (n_nodes, e_max), 0)
        tgt_1h = (node_iota_ne == tgt_row).astype(jnp.float32)        # (N, E_MAX)
        den = jnp.dot(tgt_1h, p, preferred_element_type=jnp.float32)          # (N, H)
        num = jnp.dot(tgt_1h, msg * p, preferred_element_type=jnp.float32)    # (N, H)

        # 5) normalize at node granularity (guard nodes with no in-edges: den == 0,
        #    num == 0 there, so the update is exactly zero) and apply the residual.
        inv = pl.reciprocal(jnp.where(den > 0.0, den, 1.0), approx=True)
        x_ref[...] = x + num * inv

    return kernel


def vec_gnn_layers_fused(x0, rel_table, n_edges, src_col, tgt_row, et_col, w_t, b):
    """All VecPredict layers in one pallas_call; x stays resident in VMEM."""
    N, H = x0.shape
    R = rel_table.shape[0]
    L, E_MAX, _ = src_col.shape
    kernel = _make_fused_kernel(N, E_MAX, R)
    grid_spec = pltpu.PrefetchScalarGridSpec(
        num_scalar_prefetch=1,                      # n_edges (L,) -> SMEM
        grid=(L,),
        in_specs=[
            pl.BlockSpec((None, E_MAX, 1), lambda l, ne: (l, 0, 0)),   # src  (column layout)
            pl.BlockSpec((None, 1, E_MAX), lambda l, ne: (l, 0, 0)),   # tgt  (row layout)
            pl.BlockSpec((None, E_MAX, 1), lambda l, ne: (l, 0, 0)),   # edge_type (column)
            pl.BlockSpec((N, H), lambda l, ne: (0, 0)),                # x0 (fetched once)
            pl.BlockSpec((R, H), lambda l, ne: (0, 0)),                # relation table
            pl.BlockSpec((H, H), lambda l, ne: (0, 0)),                # W^T (bf16)
            pl.BlockSpec((1, H), lambda l, ne: (0, 0)),                # bias
        ],
        out_specs=pl.BlockSpec((N, H), lambda l, ne: (0, 0)),          # resident accumulator
    )
    return pl.pallas_call(
        kernel,
        out_shape=jax.ShapeDtypeStruct((N, H), jnp.float32),
        grid_spec=grid_spec,
        compiler_params=pltpu.CompilerParams(
            dimension_semantics=("arbitrary",)),    # layers are strictly sequential
    )(n_edges, src_col, tgt_row, et_col, x0, rel_table,
      w_t.astype(jnp.bfloat16), b)


# ----------------------------------------------------------------------------
# Parameter construction (deterministic, matches module __init__ shapes)
# ----------------------------------------------------------------------------
def init_params(key, num_entities, num_relations, hidden_dim, gamma=12.0):
    epsilon = 2.0
    emb_range = (gamma + epsilon) / hidden_dim
    k1, k2, k3 = jax.random.split(key, 3)
    entity_embedding = jax.random.uniform(
        k1, (num_entities, hidden_dim), jnp.float32, -emb_range, emb_range)
    relation_embedding = jax.random.uniform(
        k2, (num_relations, hidden_dim), jnp.float32, -emb_range, emb_range)
    # attn_lin: single Linear(H, H); glorot weight, zero bias (init_weights)
    stdv = np.sqrt(6.0 / (hidden_dim + hidden_dim))
    attn_w_t = jax.random.uniform(
        k3, (hidden_dim, hidden_dim), jnp.float32, -stdv, stdv)  # W^T layout
    attn_b = jnp.zeros((1, hidden_dim), jnp.float32)
    return dict(entity_embedding=entity_embedding,
                relation_embedding=relation_embedding,
                attn_w_t=attn_w_t, attn_b=attn_b,
                hidden_dim=hidden_dim)


# ----------------------------------------------------------------------------
# Host-side graph preprocessing: pad per-layer edge lists to a fixed E_MAX.
# Only small int32 index arrays go to the device (no per-edge embedding stream).
# ----------------------------------------------------------------------------
def build_layer_arrays(graph, num_nodes, num_relations):
    edge_index = np.asarray(graph["edge_index"])
    edge_type = np.asarray(graph["edge_type"])
    # Host-side bounds check: OOB indices would silently read/write wrong VMEM.
    assert edge_index.max() < num_nodes, "edge index out of range"
    assert edge_type.max() < num_relations, "edge type out of range"

    layer_keys = sorted(graph["layer_to_edge_idxes"].keys())
    L = len(layer_keys)
    e_max = max(len(graph["layer_to_edge_idxes"][k]) for k in layer_keys)
    e_max = int(max(16, ((e_max + 15) // 16) * 16))   # 16-row pad: bf16 MXU packing

    src_col = np.zeros((L, e_max, 1), np.int32)
    tgt_row = np.zeros((L, 1, e_max), np.int32)
    et_col = np.zeros((L, e_max, 1), np.int32)
    n_edges = np.zeros((L,), np.int32)
    for li, k in enumerate(layer_keys):
        idxs = np.asarray(graph["layer_to_edge_idxes"][k], np.int64)
        ne = len(idxs)
        n_edges[li] = ne
        src_col[li, :ne, 0] = edge_index[0, idxs]
        tgt_row[li, 0, :ne] = edge_index[1, idxs]
        et_col[li, :ne, 0] = edge_type[idxs]
    return (jnp.asarray(n_edges), jnp.asarray(src_col),
            jnp.asarray(tgt_row), jnp.asarray(et_col))


# ----------------------------------------------------------------------------
# VecGNN forward (anchor init in plain JAX, all layers in the fused Pallas kernel)
# ----------------------------------------------------------------------------
def vec_gnn_forward(params, graph):
    N = graph["num_nodes"]
    H = params["hidden_dim"]
    x0 = jnp.zeros((N, H), jnp.float32)
    anchor_idx = jnp.array(graph["anchor_node_idxes"], jnp.int32)
    anchor_ent = jnp.array(graph["anchor_node_entities"], jnp.int32)
    x0 = x0.at[anchor_idx].set(params["entity_embedding"][anchor_ent])

    num_relations = params["relation_embedding"].shape[0]
    n_edges, src_col, tgt_row, et_col = build_layer_arrays(graph, N, num_relations)
    x = vec_gnn_layers_fused(x0, params["relation_embedding"],
                             n_edges, src_col, tgt_row, et_col,
                             params["attn_w_t"], params["attn_b"])
    return x, None


# Pure-JAX reference (segment ops, full f32) for correctness checking
def vec_gnn_forward_ref(params, graph):
    N = graph["num_nodes"]
    H = params["hidden_dim"]
    x = jnp.zeros((N, H), jnp.float32)
    anchor_idx = jnp.array(graph["anchor_node_idxes"], jnp.int32)
    anchor_ent = jnp.array(graph["anchor_node_entities"], jnp.int32)
    x = x.at[anchor_idx].set(params["entity_embedding"][anchor_ent])
    edge_index = graph["edge_index"]
    edge_type = graph["edge_type"]
    for layer_idx in sorted(graph["layer_to_edge_idxes"].keys()):
        idxs = np.array(graph["layer_to_edge_idxes"][layer_idx])
        src = jnp.array(edge_index[0, idxs])
        tgt = jnp.array(edge_index[1, idxs])
        rel = params["relation_embedding"][jnp.array(edge_type[idxs])]
        m = x[src] + rel
        s = m @ params["attn_w_t"] + params["attn_b"][0]
        s = s - jax.ops.segment_max(s, tgt, num_segments=N)[tgt]
        e = jnp.exp(s)
        denom = jax.ops.segment_sum(e, tgt, num_segments=N)[tgt]
        a = e / denom
        msg = m * a
        out = jax.ops.segment_sum(msg, tgt, num_segments=N)
        x = x + out
    return x, None


if __name__ == "__main__":
    num_entities, num_relations, hidden_dim = 32, 8, 128
    num_nodes = 16

    key = jax.random.PRNGKey(0)
    params = init_params(key, num_entities, num_relations, hidden_dim)

    # Small synthetic 2-layer query graph
    # layer 0: anchors -> intermediate nodes; layer 1: intermediate -> targets
    edges = np.array([[0, 1, 2, 3, 0, 4, 5, 6, 4],
                      [4, 4, 5, 5, 6, 7, 7, 8, 8]], dtype=np.int64)
    edge_type = np.array([0, 1, 2, 3, 4, 5, 6, 7, 0], dtype=np.int64)
    graph = dict(
        num_nodes=num_nodes,
        edge_index=edges,
        edge_type=edge_type,
        layer_to_edge_idxes={0: [0, 1, 2, 3, 4], 1: [5, 6, 7, 8]},
        anchor_node_idxes=[0, 1, 2, 3],
        anchor_node_entities=[3, 7, 11, 20],
    )

    x_out, _ = vec_gnn_forward(params, graph)
    x_out = jax.block_until_ready(x_out)

    x_ref, _ = vec_gnn_forward_ref(params, graph)
    x_ref = jax.block_until_ready(x_ref)

    # Tolerance relaxed vs. the f32 reference: the attention matmul runs with bf16
    # operands (f32 accumulation) and the softmax uses the EUP approximate reciprocal,
    # per the performance guidance.
    np.testing.assert_allclose(np.asarray(x_out), np.asarray(x_ref),
                               rtol=5e-2, atol=5e-3)
    print("KERNEL_OK")
</pallas_src>

<mosaic_0001>
module attributes {stable_mosaic.version = 11 : i64} {
  func.func @kernel(%arg0: i32, %arg1: memref<2xi32, #tpu.memory_space<smem>>, %arg2: memref<1x16x1xi32, #tpu.memory_space<vmem>>, %arg3: memref<1x1x16xi32, #tpu.memory_space<vmem>>, %arg4: memref<1x16x1xi32, #tpu.memory_space<vmem>>, %arg5: memref<16x128xf32, #tpu.memory_space<vmem>>, %arg6: memref<8x128xf32, #tpu.memory_space<vmem>>, %arg7: memref<128x128xbf16, #tpu.memory_space<vmem>>, %arg8: memref<1x128xf32, #tpu.memory_space<vmem>>, %arg9: memref<16x128xf32, #tpu.memory_space<vmem>>) attributes {dimension_semantics = [#tpu.dimension_semantics<arbitrary>], iteration_bounds = array<i64: 2>, scalar_prefetch = 1 : i64, scratch_operands = 0 : i64, tpu.core_type = #tpu.core_type<tc>, window_params = [{transform_indices = @transform_0, window_bounds = array<i64: 1, 16, 1>}, {transform_indices = @transform_1, window_bounds = array<i64: 1, 1, 16>}, {transform_indices = @transform_2, window_bounds = array<i64: 1, 16, 1>}, {pipeline_mode = #tpu.pipeline_mode<synchronous>, transform_indices = @transform_3, window_bounds = array<i64: 16, 128>}, {pipeline_mode = #tpu.pipeline_mode<synchronous>, transform_indices = @transform_4, window_bounds = array<i64: 8, 128>}, {pipeline_mode = #tpu.pipeline_mode<synchronous>, transform_indices = @transform_5, window_bounds = array<i64: 128, 128>}, {pipeline_mode = #tpu.pipeline_mode<synchronous>, transform_indices = @transform_6, window_bounds = array<i64: 1, 128>}, {pipeline_mode = #tpu.pipeline_mode<synchronous>, transform_indices = @transform_7, window_bounds = array<i64: 16, 128>}]} {
    %c0_i32 = arith.constant 0 : i32
    %0 = arith.cmpi eq, %arg0, %c0_i32 : i32
    %1 = arith.extui %0 : i1 to i32
    %c0_i32_0 = arith.constant 0 : i32
    %2 = arith.cmpi ne, %1, %c0_i32_0 : i32
    scf.if %2 {
      %c0_28 = arith.constant 0 : index
      %c0_29 = arith.constant 0 : index
      %64 = vector.load %arg5[%c0_28, %c0_29] : memref<16x128xf32, #tpu.memory_space<vmem>>, vector<16x128xf32>
      %c0_30 = arith.constant 0 : index
      %c0_31 = arith.constant 0 : index
      %65 = vector.load %arg9[%c0_30, %c0_31] : memref<16x128xf32, #tpu.memory_space<vmem>>, vector<16x128xf32>
      tpu.vector_store %arg9[%c0_30, %c0_31], %64 {strides = array<i32>} : memref<16x128xf32, #tpu.memory_space<vmem>>, vector<16x128xf32>,
    } else {
    }
    %3 = arith.index_cast %arg0 : i32 to index
    %4 = memref.load %arg1[%3] : memref<2xi32, #tpu.memory_space<smem>>
    %c0 = arith.constant 0 : index
    %c0_1 = arith.constant 0 : index
    %5 = vector.load %arg9[%c0, %c0_1] : memref<16x128xf32, #tpu.memory_space<vmem>>, vector<16x128xf32>
    %c0_2 = arith.constant 0 : index
    %c0_3 = arith.constant 0 : index
    %c0_4 = arith.constant 0 : index
    %6 = vector.load %arg2[%c0_2, %c0_3, %c0_4] : memref<1x16x1xi32, #tpu.memory_space<vmem>>, vector<1x16x1xi32>
    %7 = vector.shape_cast %6 : vector<1x16x1xi32> to vector<16x1xi32>
    %c0_5 = arith.constant 0 : index
    %c0_6 = arith.constant 0 : index
    %c0_7 = arith.constant 0 : index
    %8 = vector.load %arg4[%c0_5, %c0_6, %c0_7] : memref<1x16x1xi32, #tpu.memory_space<vmem>>, vector<1x16x1xi32>
    %9 = vector.shape_cast %8 : vector<1x16x1xi32> to vector<16x1xi32>
    %c0_8 = arith.constant 0 : index
    %c0_9 = arith.constant 0 : index
    %c0_10 = arith.constant 0 : index
    %10 = vector.load %arg3[%c0_8, %c0_9, %c0_10] : memref<1x1x16xi32, #tpu.memory_space<vmem>>, vector<1x1x16xi32>
    %11 = vector.shape_cast %10 : vector<1x1x16xi32> to vector<1x16xi32>
    %12 = tpu.iota {dimensions = array<i32: 0>} : vector<16x1xi32>
    %13 = vector.broadcast %4 : i32 to vector<16x1xi32>
    %14 = arith.cmpi slt, %12, %13 : vector<16x1xi32>
    %15 = tpu.iota {dimensions = array<i32: 1>} : vector<16x16xi32>
    %16 = vector.broadcast %7 : vector<16x1xi32> to vector<16x16xi32>
    %17 = arith.cmpi eq, %15, %16 : vector<16x16xi32>
    %18 = arith.extui %17 : vector<16x16xi1> to vector<16x16xi32>
    %19 = arith.sitofp %18 : vector<16x16xi32> to vector<16x16xf32>
    %20 = tpu.iota {dimensions = array<i32: 1>} : vector<16x8xi32>
    %21 = vector.broadcast %9 : vector<16x1xi32> to vector<16x8xi32>
    %22 = arith.cmpi eq, %20, %21 : vector<16x8xi32>
    %23 = arith.extui %22 : vector<16x8xi1> to vector<16x8xi32>
    %24 = arith.sitofp %23 : vector<16x8xi32> to vector<16x8xf32>
    %cst = arith.constant dense<0.000000e+00> : vector<16x128xf32>
    %25 = tpu.matmul %19, %5, %cst {dimension_numbers = #tpu.dot_dimension_numbers<[1], [0], [0], [1], [0, 0, 1, 1], [], []>} : vector<16x16xf32>, vector<16x128xf32>, vector<16x128xf32> -> vector<16x128xf32>
    %c0_11 = arith.constant 0 : index
    %c0_12 = arith.constant 0 : index
    %26 = vector.load %arg6[%c0_11, %c0_12] : memref<8x128xf32, #tpu.memory_space<vmem>>, vector<8x128xf32>
    %cst_13 = arith.constant dense<0.000000e+00> : vector<16x128xf32>
    %27 = tpu.matmul %24, %26, %cst_13 {dimension_numbers = #tpu.dot_dimension_numbers<[1], [0], [0], [1], [0, 0, 1, 1], [], []>} : vector<16x8xf32>, vector<8x128xf32>, vector<16x128xf32> -> vector<16x128xf32>
    %28 = arith.addf %25, %27 : vector<16x128xf32>
    %29 = arith.truncf %28 : vector<16x128xf32> to vector<16x128xbf16>
    %c0_14 = arith.constant 0 : index
    %c0_15 = arith.constant 0 : index
    %30 = vector.load %arg7[%c0_14, %c0_15] : memref<128x128xbf16, #tpu.memory_space<vmem>>, vector<128x128xbf16>
    %cst_16 = arith.constant dense<0.000000e+00> : vector<16x128xf32>
    %31 = tpu.matmul %29, %30, %cst_16 {dimension_numbers = #tpu.dot_dimension_numbers<[1], [0], [0], [1], [0, 0, 1, 1], [], []>} : vector<16x128xbf16>, vector<128x128xbf16>, vector<16x128xf32> -> vector<16x128xf32>
    %c0_17 = arith.constant 0 : index
    %c0_18 = arith.constant 0 : index
    %32 = vector.load %arg8[%c0_17, %c0_18] : memref<1x128xf32, #tpu.memory_space<vmem>>, vector<1x128xf32>
    %33 = vector.broadcast %32 : vector<1x128xf32> to vector<16x128xf32>
    %34 = arith.addf %31, %33 : vector<16x128xf32>
    %cst_19 = arith.constant -1.000000e+30 : f32
    %35 = vector.shape_cast %14 : vector<16x1xi1> to vector<16x1xi1>
    %36 = vector.broadcast %35 : vector<16x1xi1> to vector<16x128xi1>
    %37 = vector.broadcast %cst_19 : f32 to vector<16x128xf32>
    %38 = arith.select %36, %34, %37 : vector<16x128xi1>, vector<16x128xf32>
    %cst_20 = arith.constant dense<0xFF800000> : vector<128xf32>
    %39 = vector.multi_reduction <maximumf>, %38, %cst_20 [0] : vector<16x128xf32> to vector<128xf32>
    %40 = vector.shape_cast %39 : vector<128xf32> to vector<1x128xf32>
    %41 = vector.broadcast %40 : vector<1x128xf32> to vector<16x128xf32>
    %42 = arith.subf %34, %41 : vector<16x128xf32>
    %43 = math.exp %42 : vector<16x128xf32>
    %cst_21 = arith.constant 0.000000e+00 : f32
    %44 = vector.shape_cast %14 : vector<16x1xi1> to vector<16x1xi1>
    %45 = vector.broadcast %44 : vector<16x1xi1> to vector<16x128xi1>
    %46 = vector.broadcast %cst_21 : f32 to vector<16x128xf32>
    %47 = arith.select %45, %43, %46 : vector<16x128xi1>, vector<16x128xf32>
    %48 = tpu.iota {dimensions = array<i32: 0>} : vector<16x16xi32>
    %49 = vector.broadcast %11 : vector<1x16xi32> to vector<16x16xi32>
    %50 = arith.cmpi eq, %48, %49 : vector<16x16xi32>
    %51 = arith.extui %50 : vector<16x16xi1> to vector<16x16xi32>
    %52 = arith.sitofp %51 : vector<16x16xi32> to vector<16x16xf32>
    %cst_22 = arith.constant dense<0.000000e+00> : vector<16x128xf32>
    %53 = tpu.matmul %52, %47, %cst_22 {dimension_numbers = #tpu.dot_dimension_numbers<[1], [0], [0], [1], [0, 0, 1, 1], [], []>} : vector<16x16xf32>, vector<16x128xf32>, vector<16x128xf32> -> vector<16x128xf32>
    %54 = arith.mulf %28, %47 : vector<16x128xf32>
    %cst_23 = arith.constant dense<0.000000e+00> : vector<16x128xf32>
    %55 = tpu.matmul %52, %54, %cst_23 {dimension_numbers = #tpu.dot_dimension_numbers<[1], [0], [0], [1], [0, 0, 1, 1], [], []>} : vector<16x16xf32>, vector<16x128xf32>, vector<16x128xf32> -> vector<16x128xf32>
    %cst_24 = arith.constant 0.000000e+00 : f32
    %56 = vector.broadcast %cst_24 : f32 to vector<16x128xf32>
    %57 = arith.cmpf ogt, %53, %56 : vector<16x128xf32>
    %cst_25 = arith.constant 1.000000e+00 : f32
    %58 = vector.broadcast %cst_25 : f32 to vector<16x128xf32>
    %59 = arith.select %57, %53, %58 : vector<16x128xi1>, vector<16x128xf32>
    %60 = tpu.reciprocal %59 {approx = true} : vector<16x128xf32> -> vector<16x128xf32>
    %61 = arith.mulf %55, %60 : vector<16x128xf32>
    %62 = arith.addf %5, %61 : vector<16x128xf32>
    %c0_26 = arith.constant 0 : index
    %c0_27 = arith.constant 0 : index
    %63 = vector.load %arg9[%c0_26, %c0_27] : memref<16x128xf32, #tpu.memory_space<vmem>>, vector<16x128xf32>
    tpu.vector_store %arg9[%c0_26, %c0_27], %62 {strides = array<i32>} : memref<16x128xf32, #tpu.memory_space<vmem>>, vector<16x128xf32>,
    return
  }
  func.func @transform_0(%arg0: i32, %arg1: memref<2xi32, #tpu.memory_space<smem>>) -> (i32, i32, i32) {
    %c0_i32 = arith.constant 0 : i32
    %c0_i32_0 = arith.constant 0 : i32
    %c0_i32_1 = arith.constant 0 : i32
    return %arg0, %c0_i32, %c0_i32_0 : i32, i32, i32
  }
  func.func @transform_1(%arg0: i32, %arg1: memref<2xi32, #tpu.memory_space<smem>>) -> (i32, i32, i32) {
    %c0_i32 = arith.constant 0 : i32
    %c0_i32_0 = arith.constant 0 : i32
    %c0_i32_1 = arith.constant 0 : i32
    return %arg0, %c0_i32, %c0_i32_0 : i32, i32, i32
  }
  func.func @transform_2(%arg0: i32, %arg1: memref<2xi32, #tpu.memory_space<smem>>) -> (i32, i32, i32) {
    %c0_i32 = arith.constant 0 : i32
    %c0_i32_0 = arith.constant 0 : i32
    %c0_i32_1 = arith.constant 0 : i32
    return %arg0, %c0_i32, %c0_i32_0 : i32, i32, i32
  }
  func.func @transform_3(%arg0: i32, %arg1: memref<2xi32, #tpu.memory_space<smem>>) -> (i32, i32) {
    %c0_i32 = arith.constant 0 : i32
    %c0_i32_0 = arith.constant 0 : i32
    %c0_i32_1 = arith.constant 0 : i32
    return %c0_i32, %c0_i32_0 : i32, i32
  }
  func.func @transform_4(%arg0: i32, %arg1: memref<2xi32, #tpu.memory_space<smem>>) -> (i32, i32) {
    %c0_i32 = arith.constant 0 : i32
    %c0_i32_0 = arith.constant 0 : i32
    %c0_i32_1 = arith.constant 0 : i32
    return %c0_i32, %c0_i32_0 : i32, i32
  }
  func.func @transform_5(%arg0: i32, %arg1: memref<2xi32, #tpu.memory_space<smem>>) -> (i32, i32) {
    %c0_i32 = arith.constant 0 : i32
    %c0_i32_0 = arith.constant 0 : i32
    %c0_i32_1 = arith.constant 0 : i32
    return %c0_i32, %c0_i32_0 : i32, i32
  }
  func.func @transform_6(%arg0: i32, %arg1: memref<2xi32, #tpu.memory_space<smem>>) -> (i32, i32) {
    %c0_i32 = arith.constant 0 : i32
    %c0_i32_0 = arith.constant 0 : i32
    %c0_i32_1 = arith.constant 0 : i32
    return %c0_i32, %c0_i32_0 : i32, i32
  }
  func.func @transform_7(%arg0: i32, %arg1: memref<2xi32, #tpu.memory_space<smem>>) -> (i32, i32) {
    %c0_i32 = arith.constant 0 : i32
    %c0_i32_0 = arith.constant 0 : i32
    %c0_i32_1 = arith.constant 0 : i32
    return %c0_i32, %c0_i32_0 : i32, i32
  }
}

</mosaic_0001>

<bundles_post_ra>
// kernel: tpu_custom_call.1
= control target key start
LH: loop header
LB: loop body
LE: loop exit
PB: predicated region body
PF: predicated region fallthrough
CT: control target
= control target key end

     0   :  { %s1324_s0 = inlined_call_operand.hbm [shape: s32[2], index: 0, kind: input, shape index: {}]   ;;  %s1325_s1 = inlined_call_operand.vmem [shape: s32[2,16,1], index: 1, kind: input, shape index: {}]   ;;  %s1326_s2 = inlined_call_operand.vmem [shape: s32[2,1,16], index: 2, kind: input, shape index: {}]   ;;  %s1327_s3 = inlined_call_operand.vmem [shape: s32[2,16,1], index: 3, kind: input, shape index: {}]   ;;  %s1328_s4 = inlined_call_operand.vmem [shape: f32[16,128], index: 4, kind: input, shape index: {}]   ;;  %s1329_s5 = inlined_call_operand.vmem [shape: f32[8,128], index: 5, kind: input, shape index: {}]   ;;  %s1330_s6 = inlined_call_operand.vmem [shape: bf16[128,128], index: 6, kind: input, shape index: {}]   ;;  %s1331_s7 = inlined_call_operand.vmem [shape: f32[1,128], index: 7, kind: input, shape index: {}]   ;;  %s1332_s8 = inlined_call_operand.hbm [shape: f32[16,128], index: 8, kind: output, shape index: {}]  }
   0x1   :  { %s1067_s29 = scalar_lea.hbm %s1324_s0, 16 }
   0x2   :  { %p1068_p0 = scmp.ne.s32.totalorder %s1324_s0, %s1067_s29  ;;  %p1071_p1 = scmp.lt.u32.totalorder %s1067_s29, %s1324_s0 }
   0x4   :  { %p1073_p2 = pnand %p1071_p1, %p1068_p0 }
   0x6   :  { %1076 = shalt.err (!%p1073_p2)  }
   0x7   :  { %s1117_s12 = smov [#allocation3]  }
   0x8   :  { %14 = dma.hbm_to_smem %s1324_s0, 16, %s1117_s12, [#allocation2] }
   0x9   :  { %1107 = dma.done.wait [#allocation2], 16 }
   0xa   :  { %1108 = vsyncadd [#allocation2], 4294967280 }
   0xb   :  { %16 = sfence }
   0xc   :  { %17 = vsyncpa [#allocation5], 0  ;;  %s1181_s15 = smov 0  }
   0xd LB: > { %s1187_s16 = sadd.s32 4294967295, %s1115_s15   ;;  %p904_p3 = scmp.ge.s32.totalorder %s1115_s15, 1  ;;  %s1115_s15 = sphi %s1181_s15, %s23_s15  }
   0xe   : > { %p256_p4 = scmp.lt.s32.totalorder %s1115_s15, 3 }
  0x10   : > { %p257_p5 = pnand %p904_p3, %p256_p4 }
  0x11   : > { %p291_p6 = scmp.lt.s32.totalorder (!%p257_p5), %s1187_s16, 1  ;;  %p909_p7 = scmp.ne.s32.totalorder (!%p257_p5), %s1187_s16, 0 }
  0x12   : > { %260 = sbr.rel (%p257_p5) target bundleno = 891 (0x37b), region = 48 }
  0x19   : > { %s1193_s0 = scalar_select %p291_p6, %s1187_s16, 1 }
  0x1a   : > { %308 = sbr.rel (%p909_p7) target bundleno = 33 (0x21), region = 52  ;;  %v309_v0 = vld [vmem:[%s1328_s4] sm:$0xff] (!%p909_p7)  ;;  %v310_v1 = vld [vmem:[%s1328_s4 + $0x8] sm:$0xff] (!%p909_p7) }
  0x1b   : > { %s940_s17 = sshll.u32 %s1193_s0, 4  ;;  %s298_s20 = scalar_lea.vmem %s1326_s2, %s1193_s0  ;;  %311 = vst [vmem:[#allocation4] sm:$0xff] (!%p909_p7), %v309_v0  ;;  %312 = vst [vmem:[#allocation4 + $0x8] sm:$0xff] (!%p909_p7), %v310_v1 }
  0x1c   : > { %s295_s23 = scalar_lea.vmem %s1325_s1, %s940_s17  ;;  %s303_s26 = scalar_lea.vmem %s1327_s3, %s940_s17 }
  0x21 PF: > { %v318_v2 = vld [vmem:[%s303_s26] sm:$0xff]  ;;  %v1118_v4 = vmov 0   ;;  %v319_v5 = vld [vmem:[%s303_s26 + $0x8] sm:$0xff]  ;;  %v1119_v7 = vmov 0.0   ;;  %v1053_v14 = vld [vmem:[%s1330_s6 + $0x10] sm:$0xff]   ;;  %v321_v19 = vlaneseq  ;;  %vm354_vm0 = vcmask 64512  }
  0x22   : > { %v316_v3 = vld [vmem:[%s295_s23] sm:$0xff]  ;;  %1049 = vset.pattern.permute.xlu0 %v1118_v4  ;;  %1050 = vset.pattern.permute.xlu1 %v1118_v4  ;;  %v317_v6 = vld [vmem:[%s295_s23 + $0x8] sm:$0xff]  ;;  %v1054_v15 = vld [vmem:[%s1330_s6 + $0x18] sm:$0xff]   ;;  %vm436_vm4 = vcmask 130048   ;;  %vm1120_vm6 = vmmov 0   ;;  %s313_s10 = sld [smem:[#allocation3 + %s1187_s16]] }
  0x23   : > { %342 = vperm.xlu0 %1049, %v318_v2   ;;  %330 = vperm.xlu1 %1050, %v316_v3   ;;  %v353_v8 = vld [vmem:[%s1329_s5] sm:$0xff]  ;;  %v1219_v10 = vld [vmem:[#allocation4 + $0x8] sm:$0xff]  ;;  %v1057_v18 = vld [vmem:[%s1330_s6 + $0x30] sm:$0xff]   ;;  %v328_v20 = vand.u32 127, %v321_v19  ;;  %v322_v33 = vshrl.u32 %v321_v19, 7  ;;  %s1121_s0 = smov [#allocation4]  }
  0x24   : > { %978 = vmatprep.subr.bf16.mxu1 %v1119_v7  ;;  %966 = vmatprep.subr.mxu0 %v353_v8  ;;  %v1217_v9 = vld [vmem:[#allocation4] sm:$0xff]  ;;  %v1052_v13 = vld [vmem:[%s1330_s6 + $0x8] sm:$0xff]   ;;  %v1058_v29 = vld [vmem:[%s1330_s6 + $0x38] sm:$0xff]   ;;  %p1032_p8 = scmp.eq.s32.totalorder %s1187_s16, 1 }
  0x25   : > { %967 = vmatpush3.msra.mxu0 %v353_v8  ;;  %v1012_v11 = vpack.c.bf16 %v1219_v10, %v1217_v9  ;;  %v1051_v12 = vld [vmem:[%s1330_s6] sm:$0xff]   ;;  %v1056_v17 = vld [vmem:[%s1330_s6 + $0x28] sm:$0xff]   ;;  %994 = vmatprep.mubr.msk.bf16.mxu1 %vm1120_vm6, %v1119_v7  ;;  %v323_v37 = vadd.s32 8, %v322_v33 }
  0x26   : > { %979 = vmatpush3.bf16.msra.mxu1 %v1051_v12  ;;  %v1055_v16 = vld [vmem:[%s1330_s6 + $0x20] sm:$0xff]  }
  0x27   : > { %345 = vperm.xlu0 %1049, %v319_v5   ;;  %333 = vperm.xlu1 %1050, %v317_v6   ;;  %v927_v34 = vld [vmem:[%s298_s20] ss:$0 sm:$0xff]  ;;  %s838_s20 = sshll.u32 %s1121_s0, 4  ;;  %s839_s20 = int_to_ptr.vmem [resolvable:$true] %s838_s20 }
  0x28   : > { %1013 = vmatprep.subr.bf16.mxu0 %v1012_v11  ;;  %980 = vmatprep.subr.bf16.mxu1 %v1119_v7  ;;  %vm656_vm7 = vcmp.eq.s32.totalorder %v322_v33, %v927_v34  ;;  %v918_v36 = vld [vmem:[%s1331_s7] ss:$0 sm:$0xff]  ;;  %v324_v38 = vstv %s313_s10  ;;  %vm657_vm11 = vcmp.eq.s32.totalorder %v323_v37, %v927_v34  ;;  %s1077_s13 = scalar_lea.vmem %s839_s20, 256  ;;  %p1084_p12 = scmp.lt.s32.totalorder %s839_s20, %s839_s20 }
  0x29   : > { %v928_v35 = vsel %vm656_vm7, 1.0, %v1119_v7  ;;  %vm1272_vm8 = vcmp.lt.s32.totalorder %v322_v33, %v324_v38  ;;  %vm1276_vm9 = vcmp.lt.s32.totalorder %v323_v37, %v324_v38  ;;  %v929_v4 = vsel %vm657_vm11, 1.0, %v1119_v7  ;;  %p1078_p9 = scmp.ne.s32.totalorder %s839_s20, %s1077_s13  ;;  %p1085_p13 = scmp.lt.s32.totalorder %s1077_s13, %s1077_s13 }
  0x2a   : > { %981 = vmatpush3.bf16.msra.mxu1 %v1052_v13  ;;  %vm1017_vm10 = vmpackc.low %vm1276_vm9, %vm1272_vm8 }
  0x2b   : > { %982 = vmatprep.subr.bf16.mxu1 %v1119_v7  ;;  %p1079_p10 = pnand %p1078_p9, %p1032_p8  ;;  %p1086_p0 = por %p1085_p13, %p1084_p12 }
  0x2d   : > { %p1080_p11 = pneg %p1079_p10 }
  0x2e   : > { %983 = vmatpush3.bf16.msra.mxu1 %v1053_v14 }
  0x2f   : > { %984 = vmatprep.subr.bf16.mxu1 %v1119_v7  ;;  %p1087_p1 = pnand %p1086_p0, %p1080_p11 }
  0x32   : > { %985 = vmatpush3.bf16.msra.mxu1 %v1054_v15 }
  0x33   : > { %986 = vmatprep.subr.bf16.mxu1 %v1119_v7 }
  0x36   : > { %987 = vmatpush3.bf16.msra.mxu1 %v1055_v16 }
  0x37   : > { %988 = vmatprep.subr.bf16.mxu1 %v1119_v7 }
  0x3a   : > { %989 = vmatpush3.bf16.msra.mxu1 %v1056_v17 }
  0x3b   : > { %990 = vmatprep.subr.bf16.mxu1 %v1119_v7 }
  0x3e   : > { %991 = vmatpush3.bf16.msra.mxu1 %v1057_v18 }
  0x3f   : > { %992 = vmatprep.subr.bf16.mxu1 %v1119_v7 }
  0x42   : > { %993 = vmatpush3.bf16.msra.mxu1 %v1058_v29 }
  0xa2   : > { %v343_v21 = vpop.permute.xlu0 %342  ;;  %v331_v22 = vpop.permute.xlu1 %330 }
  0xa3   : > { %vm347_vm1 = vcmp.eq.s32.totalorder %v328_v20, %v343_v21  ;;  %vm335_vm2 = vcmp.eq.s32.totalorder %v328_v20, %v331_v22 }
  0xa4   : > { %v912_v23 = vsel %vm347_vm1, 1.0, %v1119_v7  ;;  %v910_v25 = vsel %vm335_vm2, 1.0, %v1119_v7 }
  0xa5   : > { %968 = vmatprep.mubr.msk.f32.mxu0 %vm354_vm0, %v912_v23 }
  0xa6   : > { %v346_v24 = vpop.permute.xlu0 %345  ;;  %v334_v27 = vpop.permute.xlu1 %333 }
  0xa7   : > { %vm348_vm3 = vcmp.eq.s32.totalorder %v328_v20, %v346_v24  ;;  %vm336_vm5 = vcmp.eq.s32.totalorder %v328_v20, %v334_v27 }
  0xa8   : > { %v913_v26 = vsel %vm348_vm3, 1.0, %v1119_v7  ;;  %v911_v28 = vsel %vm336_vm5, 1.0, %v1119_v7 }
  0xa9   : > { %969 = vmatmul.mubr.msk.f32.vlgmr.msra.gmra.mrb[0].mxu0 %vm354_vm0, %v913_v26 }
  0xaa   : > { %1015 = vmatpush3.bf16.msra.mxu0 %v1012_v11  ;;  %975 = vmatprep.mubr.msk.f32.mxu0 %vm436_vm4, %v910_v25 }
  0xb1   : > { %976 = vmatmul.mubr.msk.f32.vlgmr.msra.gmra.mrb[0].mxu0 %vm436_vm4, %v911_v28 }
  0xb2   : > { %1002 = vmatprep.mubr.msk.f32.mxu0 %vm436_vm4, %v928_v35 }
 0x184   : > { %v977_v30 = vpop.f32.mrb[0].mxu0 }
 0x185   : > { %v509_v31 = vpop.f32.mrb[1].mxu0 }
 0x186   : > { %v518_v32 = vpack.c.bf16 %v977_v30, %v509_v31 }
 0x188   : > { %995 = vmatmul.mubr.bf16.vlgmr.msra.gmra.mrb[0].mxu1 %v518_v32 }
 0x25b   : > { %v624_v39 = vpop.f32.mrb[0].mxu1 }
 0x25c   : > { %v625_v40 = vadd.f32 %v918_v36, %v624_v39  ;;  %v996_v41 = vpop.f32.mrb[1].mxu1 }
 0x25d   : > { %v627_v44 = vpop.f32.mrb[2].mxu1 }
 0x25e   : > { %v628_v45 = vadd.f32 %v918_v36, %v627_v44  ;;  %v997_v46 = vpop.f32.mrb[3].mxu1  ;;  %v635_v47 = vsel %vm1272_vm8, %v625_v40, -1e+30 }
 0x260   : > { %v636_v48 = vsel %vm1276_vm9, %v628_v45, -1e+30 }
 0x261   : > { %v637_v49 = vmax.f32 %v635_v47, %v636_v48 }
 0x263   : > { %v638_v50 = vrot.slane %v637_v49, 4 }
 0x265   : > { %v639_v51 = vmax.f32 %v637_v49, %v638_v50 }
 0x267   : > { %v640_v52 = vrot.slane %v639_v51, 2 }
 0x269   : > { %v641_v53 = vmax.f32 %v639_v51, %v640_v52 }
 0x26b   : > { %v642_v54 = vrot.slane %v641_v53, 1 }
 0x26d   : > { %v643_v55 = vmax.f32 %v641_v53, %v642_v54 }
 0x26f   : > { %v644_v56 = vsub.f32 %v625_v40, %v643_v55  ;;  %v645_v57 = vsub.f32 %v628_v45, %v643_v55 }
 0x271   : > { %v646_v58 = vmul.f32 1.442695, %v644_v56  ;;  %v648_v59 = vmul.f32 1.442695, %v645_v57 }
 0x273   : > { %1059 = vpow2.f32 %v646_v58 }
 0x274   : > { %1061 = vpow2.f32 %v648_v59 }
 0x27d   : > { %v1060_v60 = vpop.eup %1059 }
 0x27e   : > { %v1062_v61 = vpop.eup %1061  ;;  %v650_v62 = vsel %vm1272_vm8, %v1060_v60, 0.0 }
 0x27f   : > { %v1016_v63 = vpack.c.bf16 %v1062_v61, %v1060_v60  ;;  %v651_v0 = vsel %vm1276_vm9, %v1062_v61, 0.0  ;;  %v743_v1 = vmul.f32 %v650_v62, %v509_v31 }
 0x280   : > { %v744_v2 = vmul.f32 %v977_v30, %v651_v0 }
 0x281   : > { %1018 = vmatprep.subr.msk.bf16.mxu0 %vm1017_vm10, %v1016_v63 }
 0x282   : > { %1021 = vmatpush3.bf16.msk.msra.mxu0 %vm1017_vm10, %v1016_v63  ;;  %v1022_v3 = vpack.c.bf16 %v744_v2, %v743_v1 }
 0x284   : > { %1023 = vmatprep.subr.bf16.mxu0 %v1022_v3 }
 0x285   : > { %1003 = vmatmul.mubr.msk.f32.vlgmr.msra.gmra.mrb[2].mxu0 %vm436_vm4, %v929_v4 }
 0x286   : > { %1025 = vmatpush3.bf16.msra.mxu0 %v1022_v3  ;;  %1009 = vmatprep.mubr.msk.f32.mxu0 %vm436_vm4, %v928_v35 }
 0x289   : > { %1010 = vmatmul.mubr.msk.f32.vlgmr.msra.gmra.mrb[4].mxu0 %vm436_vm4, %v929_v4 }
 0x358   : > { %v1004_v5 = vpop.f32.mrb[2].mxu0 }
 0x359   : > { %vm821_vm12 = vcmp.gt.f32.partialorder %v1004_v5, 0.0  ;;  %v734_v6 = vpop.f32.mrb[3].mxu0 }
 0x35a   : > { %v823_v8 = vsel %vm821_vm12, %v1004_v5, 1.0  ;;  %vm820_vm13 = vcmp.gt.f32.partialorder %v734_v6, 0.0 }
 0x35b   : > { %1063 = vrcp.f32 %v823_v8  ;;  %v822_v11 = vsel %vm820_vm13, %v734_v6, 1.0 }
 0x35c   : > { %1065 = vrcp.f32 %v822_v11  ;;  %v1011_v12 = vpop.f32.mrb[4].mxu0 }
 0x35d   : > { %v811_v7 = vpop.f32.mrb[5].mxu0 }
 0x365   : > { %v1064_v13 = vpop.eup %1063 }
 0x366   : > { %v1066_v14 = vpop.eup %1065  ;;  %v827_v15 = vmul.f32 %v1064_v13, %v1011_v12 }
 0x367   : > { %v826_v16 = vmul.f32 %v1066_v14, %v811_v7 }
 0x368   : > { %v829_v17 = vadd.f32 %v827_v15, %v1219_v10 }
 0x369   : > { %v828_v18 = vadd.f32 %v826_v16, %v1217_v9 }
 0x36a   : > { %831 = vst [vmem:[#allocation4 + $0x8] sm:$0xff] %v829_v17 }
 0x36b   : > { %830 = vst [vmem:[#allocation4] sm:$0xff] %v828_v18 }
 0x36c   : > { %1090 = shalt.err (!%p1087_p1)
}
 0x36d   : > { %s1091_s18 = scalar_lea.hbm %s1332_s8, 256 }
 0x36e   : > { %p1092_p2 = scmp.ne.s32.totalorder %s1332_s8, %s1091_s18  ;;  %p1097_p5 = scmp.lt.u32.totalorder %s1091_s18, %s1332_s8 }
 0x370   : > { %p1093_p3 = pnand %p1092_p2, %p1032_p8 }
 0x372   : > { %p1094_p4 = pneg %p1093_p3 }
 0x374   : > { %p1099_p6 = pnand %p1097_p5, %p1094_p4 }
 0x376   : > { %1102 = shalt.err (!%p1099_p6)
}
 0x377   : > { %s1122_s24 = smov 128   ;;  %s1123_s25 = smov 8  }
 0x378   : > { %1029 = dma.vmem_to_hbm [thread:$0]  (%p1032_p8), %s839_s20, 256, %s1332_s8, [#allocation5], %s1122_s24, %s1122_s24, %s1123_s25  }
 0x379   : > { %1110 = dma.done.wait (%p1032_p8), [#allocation5], 256  }
 0x37a   : > { %1112 = vsyncadd (%p1032_p8), [#allocation5], 4294967040 }
 0x37b PF: > { %s23_s15 = sadd.s32 1, %s1115_s15  }
 0x37c   : > { %p20_p7 = scmp.ge.s32.totalorder %s23_s15, 4  }
 0x37e   :  { %22 = sbr.rel (!%p20_p7) target bundleno = 13 (0xd), region = 85 }
 0x385   :  { %854 = vsyncpa [#allocation5], 1 }
 0x386   :  { %856 = vsyncpa [#allocation5 + $0x1], 1 }

</bundles_post_ra>
